<compile_context>
chip_gen: v7x
topology: tpu7x:2x2x1
jax: 0.10.0
libtpu: 0.0.40
codegen_flags: <defaults>
</compile_context>

<pallas_src>
import functools

import jax
import jax.numpy as jnp
from jax.experimental import pallas as pl
from jax.experimental.pallas import tpu as pltpu


def _round_up(x, m):
    return (x + m - 1) // m * m


def _pick_tile(n, cap):
    """Largest power-of-two multiple of 128 that is <= min(n, cap)."""
    t = 128
    while t * 2 <= min(n, cap):
        t *= 2
    return t


def gcn_kernel(adj_ref, x_ref, invdeg_ref, wt_ref, b_ref, o_ref, acc_ref,
               *, normalize):
    k = pl.program_id(1)

    @pl.when(k == 0)
    def _():
        acc_ref[...] = jnp.zeros_like(acc_ref)

    # Aggregate: A_tile (tm, tk) @ X_tile (tk, Dp) as a native bf16 x bf16 MXU
    # matmul with f32 accumulation.  Self loops are already folded into A.
    acc_ref[...] += jnp.dot(adj_ref[...], x_ref[...],
                            preferred_element_type=jnp.float32)

    @pl.when(k == pl.num_programs(1) - 1)
    def _():
        agg = acc_ref[...]
        if normalize:
            # mean aggregation; 1/deg precomputed (and guarded) in glue, bcast (tm,1).
            agg = agg * invdeg_ref[...]
        # update_feat: Linear -> agg @ W^T + b  (W^T passed in as wt_ref, kept f32:
        # this matmul is tiny relative to the aggregation and keeps the output sharp).
        out = jnp.dot(agg, wt_ref[...], preferred_element_type=jnp.float32) + b_ref[...]
        o_ref[...] = out.astype(o_ref.dtype)


def gcn_conv_sparse_adj(src, dst, nfeat, weight, bias,
                        aggregator_type="mean", self_loops=True):
    """JAX wrapper mirroring GCNConvLayer_SparseAdj.forward.

    src, dst : int32 [E]  edge endpoints (graphs.edges() order: row=src, col=dst)
    nfeat    : f32  [N, D]
    weight   : f32  [D, D]  (nn.Linear weight, out = x @ W.T + b)
    bias     : f32  [D]
    """
    num_node, embed_dim = nfeat.shape
    normalize = (aggregator_type == "mean")

    # --- padding / tile selection ------------------------------------------------
    Dp = _round_up(embed_dim, 128)          # lane-dense feature dim
    Np0 = _round_up(num_node, 128)
    tm = _pick_tile(Np0, 512)               # row tile (parallel axis)
    if Np0 >= 256 and tm > Np0 // 2:
        tm = max(128, tm // 2)              # >=2 row tiles -> 2-TC sharding on v7x
    tk = _pick_tile(Np0, 2048)              # reduction tile (adjacency columns)
    Np = _round_up(num_node, max(tm, tk))   # tm, tk are powers of two -> max divides

    # --- glue: adjacency (+ self loops) and guarded inverse degree ---------------
    # One-shot padded bf16 adjacency: scatter straight into the (Np, Np) buffer and
    # cast once.  bf16 is exact for per-pair edge multiplicities < 256.
    edge_src, edge_dst = src, dst
    if self_loops:
        diag = jnp.arange(num_node, dtype=src.dtype)
        edge_src = jnp.concatenate([src, diag])
        edge_dst = jnp.concatenate([dst, diag])
    adj_p = (jnp.zeros((Np, Np), jnp.float32)
             .at[edge_src, edge_dst].add(1.0)
             .astype(jnp.bfloat16))

    degrees = jnp.zeros((num_node,), jnp.float32).at[dst].add(1.0)  # in_degrees()
    if self_loops:
        degrees = degrees + 1.0
    # Guarded inverse degree (the torch reference would produce NaN/inf for
    # isolated nodes; this is a deliberate, documented divergence).
    inv_deg = jnp.where(degrees > 0, 1.0 / jnp.maximum(degrees, 1e-30), 1.0)

    # bf16 feature stream (f32 accumulation in-kernel keeps the sum accurate).
    x_p = (jnp.zeros((Np, Dp), jnp.bfloat16)
           .at[:num_node, :embed_dim].set(nfeat.astype(jnp.bfloat16)))
    invdeg_p = jnp.ones((Np, 1), jnp.float32).at[:num_node, 0].set(inv_deg)
    wt_p = jnp.zeros((Dp, Dp), jnp.float32).at[:embed_dim, :embed_dim].set(weight.T)
    b_p = jnp.zeros((1, Dp), jnp.float32).at[0, :embed_dim].set(bias)

    grid = (Np // tm, Np // tk)
    kernel = functools.partial(gcn_kernel, normalize=normalize)

    cost = pl.CostEstimate(
        flops=2 * Np * Np * Dp + 2 * Np * Dp * Dp,
        transcendentals=0,
        bytes_accessed=(Np * Np * 2                       # bf16 adjacency stream
                        + (Np // tm) * Np * Dp * 2        # bf16 X, re-read per row tile
                        + Np * Dp * 4                     # f32 output write
                        + Dp * Dp * 4 + Np * 4 + Dp * 4), # W^T, 1/deg, bias
    )

    out_p = pl.pallas_call(
        kernel,
        out_shape=jax.ShapeDtypeStruct((Np, Dp), nfeat.dtype),
        grid_spec=pltpu.PrefetchScalarGridSpec(
            num_scalar_prefetch=0,
            grid=grid,
            in_specs=[
                pl.BlockSpec((tm, tk), lambda i, k: (i, k)),    # adjacency tile (bf16)
                pl.BlockSpec((tk, Dp), lambda i, k: (k, 0)),    # X reduction tile (bf16)
                pl.BlockSpec((tm, 1), lambda i, k: (i, 0)),     # 1/deg row tile
                pl.BlockSpec((Dp, Dp), lambda i, k: (0, 0)),    # W^T (resident)
                pl.BlockSpec((1, Dp), lambda i, k: (0, 0)),     # bias (resident)
            ],
            out_specs=pl.BlockSpec((tm, Dp), lambda i, k: (i, 0)),
            scratch_shapes=[pltpu.VMEM((tm, Dp), jnp.float32)],  # f32 accumulator
        ),
        compiler_params=pltpu.CompilerParams(
            dimension_semantics=("parallel", "arbitrary"),
            # Working set at (tm,tk)=(512,2048) is well under this; cap kept <=48 MiB
            # so the same config is safe on v7x (64 MiB physical VMEM per TC).
            vmem_limit_bytes=48 * 1024 * 1024,
        ),
        cost_estimate=cost,
    )(adj_p, x_p, invdeg_p, wt_p, b_p)

    return out_p[:num_node, :embed_dim]


def reference(src, dst, nfeat, weight, bias, self_loops=True):
    num_node = nfeat.shape[0]
    adj = jnp.zeros((num_node, num_node), jnp.float32).at[src, dst].add(1.0)
    deg = jnp.zeros((num_node,), jnp.float32).at[dst].add(1.0)
    if self_loops:
        adj = adj + jnp.eye(num_node, dtype=jnp.float32)
        deg = deg + 1.0
    rst = adj @ nfeat
    rst = rst / deg[:, None]
    return rst @ weight.T + bias


if __name__ == "__main__":
    key = jax.random.PRNGKey(0)
    k_src, k_dst, k_x, k_w, k_b = jax.random.split(key, 5)

    num_node = 16     # N
    embed_dim = 32    # D
    num_edge = 40     # E

    src = jax.random.randint(k_src, (num_edge,), 0, num_node, dtype=jnp.int32)
    dst = jax.random.randint(k_dst, (num_edge,), 0, num_node, dtype=jnp.int32)
    nfeat = jax.random.normal(k_x, (num_node, embed_dim), jnp.float32)

    # Deterministic nn.Linear(embed_dim, embed_dim)-style init (uniform ±1/sqrt(D))
    bound = 1.0 / jnp.sqrt(jnp.float32(embed_dim))
    weight = jax.random.uniform(k_w, (embed_dim, embed_dim), jnp.float32, -bound, bound)
    bias = jax.random.uniform(k_b, (embed_dim,), jnp.float32, -bound, bound)

    out = gcn_conv_sparse_adj(src, dst, nfeat, weight, bias)
    out = jax.block_until_ready(out)

    ref = reference(src, dst, nfeat, weight, bias)
    assert out.shape == (num_node, embed_dim)
    # Tolerance reflects the bf16 adjacency/feature stream (f32 accumulation);
    # counts and structure are exact, only X quantization contributes error.
    assert jnp.allclose(out, ref, atol=1e-2, rtol=1e-2), "mismatch vs reference"

    print("KERNEL_OK")
</pallas_src>

<mosaic_0001>
module attributes {stable_mosaic.version = 11 : i64} {
  func.func @gcn_kernel(%arg0: i32, %arg1: i32, %arg2: memref<128x128xbf16, #tpu.memory_space<vmem>>, %arg3: memref<128x128xbf16, #tpu.memory_space<vmem>>, %arg4: memref<128x1xf32, #tpu.memory_space<vmem>>, %arg5: memref<128x128xf32, #tpu.memory_space<vmem>>, %arg6: memref<1x128xf32, #tpu.memory_space<vmem>>, %arg7: memref<128x128xf32, #tpu.memory_space<vmem>>, %arg8: memref<128x128xf32, #tpu.memory_space<vmem>>) attributes {dimension_semantics = [#tpu.dimension_semantics<parallel>, #tpu.dimension_semantics<arbitrary>], iteration_bounds = array<i64: 1, 1>, scalar_prefetch = 0 : i64, scratch_operands = 1 : i64, tpu.core_type = #tpu.core_type<tc>, window_params = [{transform_indices = @transform_0, window_bounds = array<i64: 128, 128>}, {transform_indices = @transform_1, window_bounds = array<i64: 128, 128>}, {transform_indices = @transform_2, window_bounds = array<i64: 128, 1>}, {pipeline_mode = #tpu.pipeline_mode<synchronous>, transform_indices = @transform_3, window_bounds = array<i64: 128, 128>}, {pipeline_mode = #tpu.pipeline_mode<synchronous>, transform_indices = @transform_4, window_bounds = array<i64: 1, 128>}, {transform_indices = @transform_5, window_bounds = array<i64: 128, 128>}]} {
    %c0_i32 = arith.constant 0 : i32
    %0 = arith.cmpi eq, %arg1, %c0_i32 : i32
    %1 = arith.extui %0 : i1 to i32
    %c0_i32_0 = arith.constant 0 : i32
    %2 = arith.cmpi ne, %1, %c0_i32_0 : i32
    scf.if %2 {
      %cst_10 = arith.constant 0.000000e+00 : f32
      %12 = vector.broadcast %cst_10 : f32 to vector<128x128xf32>
      %c0_11 = arith.constant 0 : index
      %c0_12 = arith.constant 0 : index
      %13 = vector.load %arg8[%c0_11, %c0_12] : memref<128x128xf32, #tpu.memory_space<vmem>>, vector<128x128xf32>
      tpu.vector_store %arg8[%c0_11, %c0_12], %12 {strides = array<i32>} : memref<128x128xf32, #tpu.memory_space<vmem>>, vector<128x128xf32>,
    } else {
    }
    %c0 = arith.constant 0 : index
    %c0_1 = arith.constant 0 : index
    %3 = vector.load %arg8[%c0, %c0_1] : memref<128x128xf32, #tpu.memory_space<vmem>>, vector<128x128xf32>
    %c0_2 = arith.constant 0 : index
    %c0_3 = arith.constant 0 : index
    %4 = vector.load %arg2[%c0_2, %c0_3] : memref<128x128xbf16, #tpu.memory_space<vmem>>, vector<128x128xbf16>
    %c0_4 = arith.constant 0 : index
    %c0_5 = arith.constant 0 : index
    %5 = vector.load %arg3[%c0_4, %c0_5] : memref<128x128xbf16, #tpu.memory_space<vmem>>, vector<128x128xbf16>
    %cst = arith.constant dense<0.000000e+00> : vector<128x128xf32>
    %6 = tpu.matmul %4, %5, %cst {dimension_numbers = #tpu.dot_dimension_numbers<[1], [0], [0], [1], [0, 0, 1, 1], [], []>} : vector<128x128xbf16>, vector<128x128xbf16>, vector<128x128xf32> -> vector<128x128xf32>
    %7 = arith.addf %3, %6 : vector<128x128xf32>
    %c0_6 = arith.constant 0 : index
    %c0_7 = arith.constant 0 : index
    %8 = vector.load %arg8[%c0_6, %c0_7] : memref<128x128xf32, #tpu.memory_space<vmem>>, vector<128x128xf32>
    tpu.vector_store %arg8[%c0_6, %c0_7], %7 {strides = array<i32>} : memref<128x128xf32, #tpu.memory_space<vmem>>, vector<128x128xf32>,
    %c0_i32_8 = arith.constant 0 : i32
    %9 = arith.cmpi eq, %arg1, %c0_i32_8 : i32
    %10 = arith.extui %9 : i1 to i32
    %c0_i32_9 = arith.constant 0 : i32
    %11 = arith.cmpi ne, %10, %c0_i32_9 : i32
    scf.if %11 {
      %c0_10 = arith.constant 0 : index
      %c0_11 = arith.constant 0 : index
      %12 = vector.load %arg8[%c0_10, %c0_11] : memref<128x128xf32, #tpu.memory_space<vmem>>, vector<128x128xf32>
      %c0_12 = arith.constant 0 : index
      %c0_13 = arith.constant 0 : index
      %13 = vector.load %arg4[%c0_12, %c0_13] : memref<128x1xf32, #tpu.memory_space<vmem>>, vector<128x1xf32>
      %14 = vector.broadcast %13 : vector<128x1xf32> to vector<128x128xf32>
      %15 = arith.mulf %12, %14 : vector<128x128xf32>
      %c0_14 = arith.constant 0 : index
      %c0_15 = arith.constant 0 : index
      %16 = vector.load %arg5[%c0_14, %c0_15] : memref<128x128xf32, #tpu.memory_space<vmem>>, vector<128x128xf32>
      %cst_16 = arith.constant dense<0.000000e+00> : vector<128x128xf32>
      %17 = tpu.matmul %15, %16, %cst_16 {dimension_numbers = #tpu.dot_dimension_numbers<[1], [0], [0], [1], [0, 0, 1, 1], [], []>} : vector<128x128xf32>, vector<128x128xf32>, vector<128x128xf32> -> vector<128x128xf32>
      %c0_17 = arith.constant 0 : index
      %c0_18 = arith.constant 0 : index
      %18 = vector.load %arg6[%c0_17, %c0_18] : memref<1x128xf32, #tpu.memory_space<vmem>>, vector<1x128xf32>
      %19 = vector.broadcast %18 : vector<1x128xf32> to vector<128x128xf32>
      %20 = arith.addf %17, %19 : vector<128x128xf32>
      %c0_19 = arith.constant 0 : index
      %c0_20 = arith.constant 0 : index
      %21 = vector.load %arg7[%c0_19, %c0_20] : memref<128x128xf32, #tpu.memory_space<vmem>>, vector<128x128xf32>
      tpu.vector_store %arg7[%c0_19, %c0_20], %20 {strides = array<i32>} : memref<128x128xf32, #tpu.memory_space<vmem>>, vector<128x128xf32>,
    } else {
    }
    return
  }
  func.func @transform_0(%arg0: i32, %arg1: i32) -> (i32, i32) {
    %c0_i32 = arith.constant 0 : i32
    return %arg0, %arg1 : i32, i32
  }
  func.func @transform_1(%arg0: i32, %arg1: i32) -> (i32, i32) {
    %c0_i32 = arith.constant 0 : i32
    %c0_i32_0 = arith.constant 0 : i32
    return %arg1, %c0_i32 : i32, i32
  }
  func.func @transform_2(%arg0: i32, %arg1: i32) -> (i32, i32) {
    %c0_i32 = arith.constant 0 : i32
    %c0_i32_0 = arith.constant 0 : i32
    return %arg0, %c0_i32 : i32, i32
  }
  func.func @transform_3(%arg0: i32, %arg1: i32) -> (i32, i32) {
    %c0_i32 = arith.constant 0 : i32
    %c0_i32_0 = arith.constant 0 : i32
    %c0_i32_1 = arith.constant 0 : i32
    return %c0_i32, %c0_i32_0 : i32, i32
  }
  func.func @transform_4(%arg0: i32, %arg1: i32) -> (i32, i32) {
    %c0_i32 = arith.constant 0 : i32
    %c0_i32_0 = arith.constant 0 : i32
    %c0_i32_1 = arith.constant 0 : i32
    return %c0_i32, %c0_i32_0 : i32, i32
  }
  func.func @transform_5(%arg0: i32, %arg1: i32) -> (i32, i32) {
    %c0_i32 = arith.constant 0 : i32
    %c0_i32_0 = arith.constant 0 : i32
    return %arg0, %c0_i32 : i32, i32
  }
}

</mosaic_0001>

<bundles_post_ra>
// kernel: tpu_custom_call.1
= control target key start
LH: loop header
LB: loop body
LE: loop exit
PB: predicated region body
PF: predicated region fallthrough
CT: control target
= control target key end

     0   :  { %10 = vsyncpa [#allocation4], 0  ;;  %s1132_s0 = inlined_call_operand.hbm [shape: bf16[128,128], index: 0, kind: input, shape index: {}]   ;;  %s1133_s1 = inlined_call_operand.hbm [shape: bf16[128,128], index: 1, kind: input, shape index: {}]   ;;  %s1134_s2 = inlined_call_operand.vmem [shape: f32[128,1], index: 2, kind: input, shape index: {}]   ;;  %s1135_s3 = inlined_call_operand.vmem [shape: f32[128,128], index: 3, kind: input, shape index: {}]   ;;  %s1136_s4 = inlined_call_operand.vmem [shape: f32[1,128], index: 4, kind: input, shape index: {}]   ;;  %s1137_s5 = inlined_call_operand.hbm [shape: f32[128,128], index: 5, kind: output, shape index: {}]  }
   0x1   :  { %11 = vsyncpa [#allocation7], 0 }
   0x2   :  { %12 = vsyncpa [#allocation5], 0  ;;  %s959_s18 = smov [#allocation3]   ;;  %s887_s22 = scalar_lea.hbm %s1132_s0, 1024 }
   0x3   :  { %s18_s19 = sshll.u32 %s959_s18, 4  ;;  %p888_p0 = scmp.ne.s32.totalorder %s1132_s0, %s887_s22  ;;  %s19_s19 = int_to_ptr.vmem [resolvable:$true] %s18_s19 }
   0x4   :  { %p891_p1 = scmp.lt.u32.totalorder %s887_s22, %s1132_s0 }
   0x6   :  { %p893_p2 = pnand %p891_p1, %p888_p0 }
   0x8   :  { %896 = shalt.err (!%p893_p2)
}
   0x9   :  { %s897_s27 = scalar_lea.vmem %s19_s19, 1024  ;;  %p902_p4 = scmp.lt.s32.totalorder %s19_s19, %s19_s19 }
   0xa   :  { %p898_p3 = scmp.ne.s32.totalorder %s19_s19, %s897_s27  ;;  %p903_p5 = scmp.lt.s32.totalorder %s897_s27, %s897_s27 }
   0xc   :  { %p904_p6 = por %p903_p5, %p902_p4 }
   0xe   :  { %p905_p7 = pnand %p904_p6, %p898_p3 }
  0x10   :  { %908 = shalt.err (!%p905_p7)
}
  0x11   :  { %s960_s28 = smov 64   ;;  %s961_s29 = smov 4  }
  0x12   :  { %24 = dma.hbm_to_vmem [thread:$0]  %s1132_s0, 1024, %s19_s19, [#allocation4], %s960_s28, %s960_s28, %s961_s29  }
  0x13   :  { %s962_s7 = smov [#allocation6]   ;;  %s909_s11 = scalar_lea.hbm %s1133_s1, 1024 }
  0x14   :  { %s30_s8 = sshll.u32 %s962_s7, 4  ;;  %p910_p8 = scmp.ne.s32.totalorder %s1133_s1, %s909_s11  ;;  %s31_s8 = int_to_ptr.vmem [resolvable:$true] %s30_s8 }
  0x15   :  { %p913_p9 = scmp.lt.u32.totalorder %s909_s11, %s1133_s1 }
  0x17   :  { %p915_p10 = pnand %p913_p9, %p910_p8 }
  0x19   :  { %918 = shalt.err (!%p915_p10)
}
  0x1a   :  { %s919_s16 = scalar_lea.vmem %s31_s8, 1024  ;;  %p924_p12 = scmp.lt.s32.totalorder %s31_s8, %s31_s8 }
  0x1b   :  { %p920_p11 = scmp.ne.s32.totalorder %s31_s8, %s919_s16  ;;  %p925_p13 = scmp.lt.s32.totalorder %s919_s16, %s919_s16 }
  0x1d   :  { %p926_p0 = por %p925_p13, %p924_p12 }
  0x1f   :  { %p927_p1 = pnand %p926_p0, %p920_p11 }
  0x21   :  { %930 = shalt.err (!%p927_p1)
}
  0x22   :  { %36 = dma.hbm_to_vmem [thread:$0]  %s1133_s1, 1024, %s31_s8, [#allocation7], %s960_s28, %s960_s28, %s961_s29  }
  0x23   :  { %953 = dma.done.wait [#allocation4], 1024  }
  0x24   :  { %954 = vsyncadd [#allocation4], 4294966272 }
  0x25   :  { %955 = dma.done.wait [#allocation7], 1024  }
  0x26   :  { %956 = vsyncadd [#allocation7], 4294966272  ;;  %v963_v0 = vmov 0   ;;  %v871_v1 = vld [vmem:[#allocation6] sm:$0xff]   ;;  %v872_v2 = vld [vmem:[#allocation6 + $0x8] sm:$0xff]  }
  0x27   :  { %869 = vset.pattern.permute.xlu0 %v963_v0  ;;  %870 = vset.pattern.permute.xlu1 %v963_v0  ;;  %v873_v3 = vld [vmem:[#allocation6 + $0x10] sm:$0xff]   ;;  %v874_v4 = vld [vmem:[#allocation6 + $0x18] sm:$0xff]   ;;  %v879_v5 = vld [vmem:[#allocation3] sm:$0xff]  }
  0x28   :  { %741 = vmatprep.subr.bf16.mxu0 %v871_v1  ;;  %757 = vmatprep.mubr.bf16.mxu0 %v879_v5  ;;  %v875_v6 = vld [vmem:[#allocation6 + $0x20] sm:$0xff]   ;;  %v876_v7 = vld [vmem:[#allocation6 + $0x28] sm:$0xff]   ;;  %v364_v9 = vld [vmem:[%s1134_s2 + $0x10] sm:$0xff] }
  0x29   :  { %742 = vmatpush3.bf16.msra.mxu0 %v871_v1  ;;  %v362_v8 = vld [vmem:[%s1134_s2] sm:$0xff]  ;;  %390 = vperm.xlu1 %870, %v364_v9   ;;  %v363_v10 = vld [vmem:[%s1134_s2 + $0x8] sm:$0xff]  ;;  %v365_v11 = vld [vmem:[%s1134_s2 + $0x18] sm:$0xff] }
  0x2a   :  { %743 = vmatprep.subr.bf16.mxu0 %v872_v2  ;;  %380 = vperm.xlu0 %869, %v362_v8   ;;  %v877_v12 = vld [vmem:[#allocation6 + $0x30] sm:$0xff]   ;;  %v366_v13 = vld [vmem:[%s1134_s2 + $0x20] sm:$0xff]  ;;  %v475_v15 = vld [vmem:[%s1135_s3 + $0x8] sm:$0xff] }
  0x2b   :  { %v474_v14 = vld [vmem:[%s1135_s3] sm:$0xff]  ;;  %v367_v16 = vld [vmem:[%s1134_s2 + $0x28] sm:$0xff]  ;;  %v476_v18 = vld [vmem:[%s1135_s3 + $0x10] sm:$0xff] }
  0x2c   :  { %v829_v17 = vpack.c.bf16 %v475_v15, %v474_v14  ;;  %v477_v19 = vld [vmem:[%s1135_s3 + $0x18] sm:$0xff]  ;;  %v478_v22 = vld [vmem:[%s1135_s3 + $0x20] sm:$0xff]  ;;  %v479_v23 = vld [vmem:[%s1135_s3 + $0x28] sm:$0xff] }
  0x2d   :  { %744 = vmatpush3.bf16.msra.mxu0 %v872_v2  ;;  %395 = vperm.xlu1 %870, %v365_v11   ;;  %v833_v20 = vpack.c.bf16 %v477_v19, %v476_v18  ;;  %v878_v21 = vld [vmem:[#allocation6 + $0x38] sm:$0xff]   ;;  %v368_v24 = vld [vmem:[%s1134_s2 + $0x30] sm:$0xff]  ;;  %v837_v26 = vpack.c.bf16 %v479_v23, %v478_v22  ;;  %v880_v29 = vld [vmem:[#allocation3 + $0x8] sm:$0xff]  }
  0x2e   :  { %745 = vmatprep.subr.bf16.mxu0 %v873_v3  ;;  %385 = vperm.xlu0 %869, %v363_v10   ;;  %v369_v25 = vld [vmem:[%s1134_s2 + $0x38] sm:$0xff]  ;;  %v480_v27 = vld [vmem:[%s1135_s3 + $0x30] sm:$0xff]  ;;  %v370_v30 = vld [vmem:[%s1134_s2 + $0x40] sm:$0xff] }
  0x2f   :  { %830 = vmatprep.subr.bf16.mxu1 %v829_v17  ;;  %v481_v28 = vld [vmem:[%s1135_s3 + $0x38] sm:$0xff]  ;;  %v371_v31 = vld [vmem:[%s1134_s2 + $0x48] sm:$0xff]  ;;  %v881_v32 = vld [vmem:[#allocation3 + $0x10] sm:$0xff]  }
  0x30   :  { %832 = vmatpush3.bf16.msra.mxu1 %v829_v17  ;;  %v841_v33 = vpack.c.bf16 %v481_v28, %v480_v27  ;;  %v482_v34 = vld [vmem:[%s1135_s3 + $0x40] sm:$0xff]  ;;  %v483_v35 = vld [vmem:[%s1135_s3 + $0x48] sm:$0xff]  ;;  %v372_v36 = vld [vmem:[%s1134_s2 + $0x50] sm:$0xff] }
  0x31   :  { %746 = vmatpush3.bf16.msra.mxu0 %v873_v3  ;;  %405 = vperm.xlu1 %870, %v367_v16   ;;  %v373_v37 = vld [vmem:[%s1134_s2 + $0x58] sm:$0xff]  ;;  %v845_v38 = vpack.c.bf16 %v483_v35, %v482_v34  ;;  %v484_v39 = vld [vmem:[%s1135_s3 + $0x50] sm:$0xff]  ;;  %v374_v42 = vld [vmem:[%s1134_s2 + $0x60] sm:$0xff] }
  0x32   :  { %747 = vmatprep.subr.bf16.mxu0 %v874_v4  ;;  %400 = vperm.xlu0 %869, %v366_v13   ;;  %v485_v40 = vld [vmem:[%s1135_s3 + $0x58] sm:$0xff]  ;;  %v375_v43 = vld [vmem:[%s1134_s2 + $0x68] sm:$0xff]  ;;  %v883_v44 = vld [vmem:[#allocation3 + $0x20] sm:$0xff]  }
  0x33   :  { %834 = vmatprep.subr.bf16.mxu1 %v833_v20  ;;  %v882_v41 = vld [vmem:[#allocation3 + $0x18] sm:$0xff]   ;;  %v849_v45 = vpack.c.bf16 %v485_v40, %v484_v39  ;;  %v486_v46 = vld [vmem:[%s1135_s3 + $0x60] sm:$0xff]  ;;  %v487_v47 = vld [vmem:[%s1135_s3 + $0x68] sm:$0xff] }
  0x34   :  { %836 = vmatpush3.bf16.msra.mxu1 %v833_v20  ;;  %v376_v48 = vld [vmem:[%s1134_s2 + $0x70] sm:$0xff]  ;;  %v377_v49 = vld [vmem:[%s1134_s2 + $0x78] sm:$0xff]  ;;  %v853_v50 = vpack.c.bf16 %v487_v47, %v486_v46  ;;  %v884_v51 = vld [vmem:[#allocation3 + $0x28] sm:$0xff]  }
  0x35   :  { %748 = vmatpush3.bf16.msra.mxu0 %v874_v4  ;;  %415 = vperm.xlu1 %870, %v369_v25   ;;  %v885_v52 = vld [vmem:[#allocation3 + $0x30] sm:$0xff]   ;;  %v886_v53 = vld [vmem:[#allocation3 + $0x38] sm:$0xff]  }
  0x36   :  { %749 = vmatprep.subr.bf16.mxu0 %v875_v6  ;;  %410 = vperm.xlu0 %869, %v368_v24   ;;  %v488_v54 = vld [vmem:[%s1135_s3 + $0x70] sm:$0xff]  ;;  %v489_v55 = vld [vmem:[%s1135_s3 + $0x78] sm:$0xff] }
  0x37   :  { %838 = vmatprep.subr.bf16.mxu1 %v837_v26  ;;  %v857_v56 = vpack.c.bf16 %v489_v55, %v488_v54 }
  0x38   :  { %840 = vmatpush3.bf16.msra.mxu1 %v837_v26 }
  0x39   :  { %750 = vmatpush3.bf16.msra.mxu0 %v875_v6  ;;  %425 = vperm.xlu1 %870, %v371_v31  }
  0x3a   :  { %751 = vmatprep.subr.bf16.mxu0 %v876_v7  ;;  %420 = vperm.xlu0 %869, %v370_v30  }
  0x3b   :  { %842 = vmatprep.subr.bf16.mxu1 %v841_v33 }
  0x3c   :  { %844 = vmatpush3.bf16.msra.mxu1 %v841_v33 }
  0x3d   :  { %752 = vmatpush3.bf16.msra.mxu0 %v876_v7  ;;  %435 = vperm.xlu1 %870, %v373_v37  }
  0x3e   :  { %753 = vmatprep.subr.bf16.mxu0 %v877_v12  ;;  %430 = vperm.xlu0 %869, %v372_v36  }
  0x3f   :  { %846 = vmatprep.subr.bf16.mxu1 %v845_v38 }
  0x40   :  { %848 = vmatpush3.bf16.msra.mxu1 %v845_v38 }
  0x41   :  { %754 = vmatpush3.bf16.msra.mxu0 %v877_v12  ;;  %445 = vperm.xlu1 %870, %v375_v43  }
  0x42   :  { %755 = vmatprep.subr.bf16.mxu0 %v878_v21  ;;  %440 = vperm.xlu0 %869, %v374_v42  }
  0x43   :  { %850 = vmatprep.subr.bf16.mxu1 %v849_v45 }
  0x44   :  { %852 = vmatpush3.bf16.msra.mxu1 %v849_v45 }
  0x45   :  { %756 = vmatpush3.bf16.msra.mxu0 %v878_v21  ;;  %455 = vperm.xlu1 %870, %v377_v49  }
  0x46   :  { %450 = vperm.xlu0 %869, %v376_v48   ;;  %854 = vmatprep.subr.bf16.mxu1 %v853_v50 }
  0x48   :  { %758 = vmatmul.mubr.bf16.vlgmr.msra.gmra.mrb[0].mxu0 %v880_v29  ;;  %856 = vmatpush3.bf16.msra.mxu1 %v853_v50 }
  0x49   :  { %761 = vmatprep.mubr.bf16.mxu0 %v881_v32  ;;  %858 = vmatprep.subr.bf16.mxu1 %v857_v56 }
  0x4c   :  { %860 = vmatpush3.bf16.msra.mxu1 %v857_v56 }
  0x50   :  { %762 = vmatmul.mubr.bf16.gmra.mrb[4].mxu0 %v882_v41  ;;  %v692_v41 = vld [vmem:[%s1136_s4] ss:$0 sm:$0xff]  ;;  %s964_s4 = smov [#allocation8]  }
  0x51   :  { %765 = vmatprep.mubr.bf16.mxu0 %v883_v44  ;;  %s663_s27 = sshll.u32 %s964_s4, 4  ;;  %s664_s27 = int_to_ptr.vmem [resolvable:$true] %s663_s27 }
  0x52   :  { %s931_s28 = scalar_lea.vmem %s664_s27, 2048  ;;  %p936_p3 = scmp.lt.s32.totalorder %s664_s27, %s664_s27 }
  0x53   :  { %p932_p2 = scmp.ne.s32.totalorder %s664_s27, %s931_s28  ;;  %p937_p4 = scmp.lt.s32.totalorder %s931_s28, %s931_s28 }
  0x55   :  { %p938_p5 = por %p937_p4, %p936_p3 }
  0x57   :  { %p939_p6 = pnand %p938_p5, %p932_p2 }
  0x58   :  { %766 = vmatmul.mubr.bf16.gmra.mrb[8].mxu0 %v884_v51 }
  0x59   :  { %769 = vmatprep.mubr.bf16.mxu0 %v885_v52 }
  0x60   :  { %770 = vmatmul.mubr.bf16.gmra.mrb[12].mxu0 %v886_v53 }
  0xa8   :  { %v391_v58 = vpop.permute.xlu1 %390 }
  0xa9   :  { %v381_v57 = vpop.permute.xlu0 %380 }
  0xac   :  { %v396_v60 = vpop.permute.xlu1 %395 }
  0xad   :  { %v386_v59 = vpop.permute.xlu0 %385 }
  0xb0   :  { %v406_v63 = vpop.permute.xlu1 %405 }
  0xb1   :  { %v401_v61 = vpop.permute.xlu0 %400 }
  0xb4   :  { %v416_v7 = vpop.permute.xlu1 %415 }
  0xb5   :  { %v411_v4 = vpop.permute.xlu0 %410 }
  0xb8   :  { %v426_v16 = vpop.permute.xlu1 %425 }
  0xb9   :  { %v421_v11 = vpop.permute.xlu0 %420 }
  0xbc   :  { %v436_v24 = vpop.permute.xlu1 %435 }
  0xbd   :  { %v431_v18 = vpop.permute.xlu0 %430 }
  0xc0   :  { %v446_v31 = vpop.permute.xlu1 %445 }
  0xc1   :  { %v441_v28 = vpop.permute.xlu0 %440 }
  0xc4   :  { %v456_v39 = vpop.permute.xlu1 %455 }
  0xc5   :  { %v451_v36 = vpop.permute.xlu0 %450 }
 0x11b   :  { %v759_v62 = vpop.f32.mrb[0].mxu0 }
 0x11c   :  { %v248_v0 = vpop.f32.mrb[1].mxu0  ;;  %v460_v6 = vmul.f32 %v759_v62, %v391_v58 }
 0x11d   :  { %v760_v1 = vpop.f32.mrb[2].mxu0  ;;  %v458_v2 = vmul.f32 %v381_v57, %v248_v0 }
 0x11e   :  { %v251_v3 = vpop.f32.mrb[3].mxu0  ;;  %v461_v8 = vmul.f32 %v760_v1, %v396_v60 }
 0x11f   :  { %v459_v5 = vmul.f32 %v386_v59, %v251_v3  ;;  %805 = vmatprep.mubr.f32.mxu1 %v458_v2 }
 0x121   :  { %806 = vmatmul.mubr.f32.vlgmr.msra.gmra.mrb[0].mxu1 %v459_v5 }
 0x122   :  { %808 = vmatprep.mubr.f32.mxu1 %v460_v6 }
 0x123   :  { %v763_v9 = vpop.f32.mrb[4].mxu0 }
 0x124   :  { %v264_v10 = vpop.f32.mrb[5].mxu0  ;;  %v464_v17 = vmul.f32 %v763_v9, %v411_v4 }
 0x125   :  { %v462_v12 = vmul.f32 %v401_v61, %v264_v10  ;;  %v764_v13 = vpop.f32.mrb[6].mxu0  ;;  %809 = vmatmul.mubr.f32.gmra.mrb[2].mxu1 %v461_v8 }
 0x126   :  { %v267_v14 = vpop.f32.mrb[7].mxu0  ;;  %v465_v19 = vmul.f32 %v764_v13, %v416_v7 }
 0x127   :  { %v463_v15 = vmul.f32 %v406_v63, %v267_v14  ;;  %811 = vmatprep.mubr.f32.mxu1 %v462_v12 }
 0x129   :  { %812 = vmatmul.mubr.f32.gmra.mrb[4].mxu1 %v463_v15 }
 0x12a   :  { %814 = vmatprep.mubr.f32.mxu1 %v464_v17 }
 0x12b   :  { %v767_v20 = vpop.f32.mrb[8].mxu0 }
 0x12c   :  { %v280_v21 = vpop.f32.mrb[9].mxu0  ;;  %v468_v27 = vmul.f32 %v767_v20, %v431_v18 }
 0x12d   :  { %v466_v22 = vmul.f32 %v421_v11, %v280_v21  ;;  %v768_v23 = vpop.f32.mrb[10].mxu0  ;;  %815 = vmatmul.mubr.f32.gmra.mrb[6].mxu1 %v465_v19 }
 0x12e   :  { %v283_v25 = vpop.f32.mrb[11].mxu0  ;;  %v469_v29 = vmul.f32 %v768_v23, %v436_v24 }
 0x12f   :  { %v467_v26 = vmul.f32 %v426_v16, %v283_v25  ;;  %817 = vmatprep.mubr.f32.mxu1 %v466_v22 }
 0x131   :  { %818 = vmatmul.mubr.f32.gmra.mrb[8].mxu1 %v467_v26 }
 0x132   :  { %820 = vmatprep.mubr.f32.mxu1 %v468_v27 }
 0x133   :  { %v771_v30 = vpop.f32.mrb[12].mxu0 }
 0x134   :  { %v296_v32 = vpop.f32.mrb[13].mxu0  ;;  %v472_v38 = vmul.f32 %v771_v30, %v451_v36 }
 0x135   :  { %v470_v33 = vmul.f32 %v441_v28, %v296_v32  ;;  %v772_v34 = vpop.f32.mrb[14].mxu0  ;;  %821 = vmatmul.mubr.f32.gmra.mrb[10].mxu1 %v469_v29 }
 0x136   :  { %v299_v35 = vpop.f32.mrb[15].mxu0  ;;  %v473_v40 = vmul.f32 %v772_v34, %v456_v39 }
 0x137   :  { %v471_v37 = vmul.f32 %v446_v31, %v299_v35  ;;  %823 = vmatprep.mubr.f32.mxu1 %v470_v33 }
 0x139   :  { %824 = vmatmul.mubr.f32.gmra.mrb[12].mxu1 %v471_v37 }
 0x13a   :  { %826 = vmatprep.mubr.f32.mxu1 %v472_v38 }
 0x13d   :  { %827 = vmatmul.mubr.f32.gmra.mrb[14].mxu1 %v473_v40 }
 0x1f4   :  { %v807_v42 = vpop.f32.mrb[0].mxu1 }
 0x1f5   :  { %v569_v43 = vadd.f32 %v807_v42, %v692_v41  ;;  %v563_v44 = vpop.f32.mrb[1].mxu1 }
 0x1f6   :  { %v564_v45 = vadd.f32 %v692_v41, %v563_v44 }
 0x1f7   :  { %643 = vst [vmem:[#allocation8 + $0x8] sm:$0xff] %v569_v43 }
 0x1f8   :  { %642 = vst [vmem:[#allocation8] sm:$0xff] %v564_v45  ;;  %v810_v46 = vpop.f32.mrb[2].mxu1 }
 0x1f9   :  { %v579_v47 = vadd.f32 %v810_v46, %v692_v41  ;;  %v573_v48 = vpop.f32.mrb[3].mxu1 }
 0x1fa   :  { %v574_v49 = vadd.f32 %v692_v41, %v573_v48 }
 0x1fb   :  { %645 = vst [vmem:[#allocation8 + $0x18] sm:$0xff] %v579_v47 }
 0x1fc   :  { %644 = vst [vmem:[#allocation8 + $0x10] sm:$0xff] %v574_v49  ;;  %v813_v50 = vpop.f32.mrb[4].mxu1 }
 0x1fd   :  { %v589_v51 = vadd.f32 %v813_v50, %v692_v41  ;;  %v583_v52 = vpop.f32.mrb[5].mxu1 }
 0x1fe   :  { %v584_v53 = vadd.f32 %v692_v41, %v583_v52 }
 0x1ff   :  { %647 = vst [vmem:[#allocation8 + $0x28] sm:$0xff] %v589_v51 }
 0x200   :  { %646 = vst [vmem:[#allocation8 + $0x20] sm:$0xff] %v584_v53  ;;  %v816_v54 = vpop.f32.mrb[6].mxu1 }
 0x201   :  { %v599_v55 = vadd.f32 %v816_v54, %v692_v41  ;;  %v593_v56 = vpop.f32.mrb[7].mxu1 }
 0x202   :  { %v594_v57 = vadd.f32 %v692_v41, %v593_v56 }
 0x203   :  { %649 = vst [vmem:[#allocation8 + $0x38] sm:$0xff] %v599_v55 }
 0x204   :  { %648 = vst [vmem:[#allocation8 + $0x30] sm:$0xff] %v594_v57  ;;  %v819_v58 = vpop.f32.mrb[8].mxu1 }
 0x205   :  { %v609_v59 = vadd.f32 %v819_v58, %v692_v41  ;;  %v603_v60 = vpop.f32.mrb[9].mxu1 }
 0x206   :  { %v604_v61 = vadd.f32 %v692_v41, %v603_v60 }
 0x207   :  { %651 = vst [vmem:[#allocation8 + $0x48] sm:$0xff] %v609_v59 }
 0x208   :  { %650 = vst [vmem:[#allocation8 + $0x40] sm:$0xff] %v604_v61  ;;  %v822_v62 = vpop.f32.mrb[10].mxu1 }
 0x209   :  { %v619_v63 = vadd.f32 %v822_v62, %v692_v41  ;;  %v613_v0 = vpop.f32.mrb[11].mxu1 }
 0x20a   :  { %v614_v1 = vadd.f32 %v692_v41, %v613_v0 }
 0x20b   :  { %653 = vst [vmem:[#allocation8 + $0x58] sm:$0xff] %v619_v63 }
 0x20c   :  { %652 = vst [vmem:[#allocation8 + $0x50] sm:$0xff] %v614_v1  ;;  %v825_v2 = vpop.f32.mrb[12].mxu1 }
 0x20d   :  { %v629_v3 = vadd.f32 %v825_v2, %v692_v41  ;;  %v623_v4 = vpop.f32.mrb[13].mxu1 }
 0x20e   :  { %v624_v5 = vadd.f32 %v692_v41, %v623_v4 }
 0x20f   :  { %655 = vst [vmem:[#allocation8 + $0x68] sm:$0xff] %v629_v3 }
 0x210   :  { %654 = vst [vmem:[#allocation8 + $0x60] sm:$0xff] %v624_v5  ;;  %v828_v6 = vpop.f32.mrb[14].mxu1 }
 0x211   :  { %v639_v7 = vadd.f32 %v828_v6, %v692_v41  ;;  %v633_v8 = vpop.f32.mrb[15].mxu1 }
 0x212   :  { %v634_v9 = vadd.f32 %v692_v41, %v633_v8 }
 0x213   :  { %657 = vst [vmem:[#allocation8 + $0x78] sm:$0xff] %v639_v7 }
 0x214   :  { %656 = vst [vmem:[#allocation8 + $0x70] sm:$0xff] %v634_v9 }
 0x215   :  { %942 = shalt.err (!%p939_p6)
}
 0x216   :  { %s943_s6 = scalar_lea.hbm %s1137_s5, 2048 }
 0x217   :  { %p944_p7 = scmp.ne.s32.totalorder %s1137_s5, %s943_s6  ;;  %p947_p8 = scmp.lt.u32.totalorder %s943_s6, %s1137_s5 }
 0x219   :  { %p949_p9 = pnand %p947_p8, %p944_p7 }
 0x21b   :  { %952 = shalt.err (!%p949_p9)
}
 0x21c   :  { %s965_s11 = smov 128   ;;  %s966_s12 = smov 8  }
 0x21d   :  { %669 = dma.vmem_to_hbm [thread:$0]  %s664_s27, 2048, %s1137_s5, [#allocation5], %s965_s11, %s965_s11, %s966_s12  }
 0x21e   :  { %957 = dma.done.wait [#allocation5], 2048  }
 0x21f   :  { %958 = vsyncadd [#allocation5], 4294965248 }
 0x220   :  { %673 = vsyncpa [#allocation4], 1 }
 0x221   :  { %674 = vsyncpa [#allocation7], 1 }
 0x222   :  { %675 = vsyncpa [#allocation5], 1 }

</bundles_post_ra>
